<compile_context>
chip_gen: v7x
topology: tpu7x:2x2x1
jax: 0.10.0
libtpu: 0.0.40
codegen_flags: <defaults>
</compile_context>

<pallas_src>
import jax
import jax.numpy as jnp
from jax.experimental import pallas as pl
from jax.experimental.pallas import tpu as pltpu

# Loss coefficients from ActorLoss.__init__ defaults (values used in this call).
NS = 0.9
ND = 0.1
NE = 0.003


def _round_up(x, m):
    return ((x + m - 1) // m) * m


def _make_actor_loss_kernel(total_rows, need_mask):
    """Kernel closure over the static row count / ragged-tile flag."""

    def kernel(idx_ref, logits_ref, v_ref, ve_ref, out_ref):
        tb, na = logits_ref.shape

        # Cast to f32 inside the kernel (inputs may be bf16 in HBM).
        logits = logits_ref[...].astype(jnp.float32)   # (tb, A)
        idx = idx_ref[...]                             # (tb, 1) int32
        v = v_ref[...].astype(jnp.float32)             # (tb, 1)
        ve = ve_ref[...].astype(jnp.float32)           # (tb, 1)

        if need_mask:
            # Only the ragged last tile has padded rows; mask BEFORE exp so
            # OOB garbage (possible NaN/Inf) cannot poison the reductions.
            row0 = pl.program_id(0) * tb
            rows = row0 + jax.lax.broadcasted_iota(jnp.int32, (tb, 1), 0)
            mask = rows < total_rows                   # (tb, 1) bool
            logits = jnp.where(mask, logits, 0.0)
            v = jnp.where(mask, v, 0.0)
            ve = jnp.where(mask, ve, 0.0)

        # One-hot selection via iota compare (actions live on the lane axis).
        lane = jax.lax.broadcasted_iota(jnp.int32, (tb, na), 1)
        onehot = lane == idx                           # (tb, A) bool

        # Single-exp softmax statistics (exp issued exactly once per tile).
        m = jnp.max(logits, axis=-1, keepdims=True)
        s = logits - m                                 # (tb, A)
        es = jnp.exp(s)                                # (tb, A)
        z = jnp.sum(es, axis=-1, keepdims=True)        # (tb, 1)
        logz = jnp.log(z)                              # (tb, 1)

        # log_prob(a) = s[idx] - logZ ;  entropy = logZ - sum(es * s) / Z
        logp = jnp.sum(jnp.where(onehot, s, 0.0), axis=-1, keepdims=True) - logz
        ent = logz - jnp.sum(es * s, axis=-1, keepdims=True) / z

        # .detach() is a no-op for the forward value.
        adv = v - ve
        loss_row = -NS * logp * adv - ND * v - NE * ent    # (tb, 1)
        if need_mask:
            loss_row = jnp.where(mask, loss_row, 0.0)

        # Per-tile scalar partial sum written lane-dense: lane 0 carries the
        # value, lanes 1..127 are zeros (full-width unmasked store).
        total = jnp.sum(loss_row)
        lane0 = jax.lax.broadcasted_iota(jnp.int32, (1, 128), 1) == 0
        out_ref[...] = jnp.where(lane0, total, 0.0)

    return kernel


def actor_loss(a, logits, V, ve, *, tile_rows=2048):
    """JAX/Pallas equivalent of ActorLoss.forward (returns a scalar).

    a      : (..., A) one-hot action sample (float) OR (...) int action indices
    logits : (..., A) action-distribution logits (dist_a)
    V, ve  : (..., 1) value and value target
    """
    A = logits.shape[-1]
    l2 = logits.reshape(-1, A)
    v2 = V.reshape(-1, 1)
    ve2 = ve.reshape(-1, 1)
    B = l2.shape[0]

    # Kernel consumes int32 indices (reads (B,1) ints instead of a (B,A)
    # one-hot -> ~half the input HBM bytes).  For exactly-one-hot `a` (the
    # DreamerV2 sample convention) argmax recovers the sampled index, so the
    # value is identical to sum(a * log_softmax(logits)).
    if jnp.issubdtype(a.dtype, jnp.integer):
        idx2 = a.reshape(-1, 1).astype(jnp.int32)
    else:
        idx2 = jnp.argmax(a.reshape(-1, A), axis=-1).astype(jnp.int32)
        idx2 = idx2.reshape(-1, 1)

    # Tile selection: big tiles to amortize per-step overhead; full array as a
    # single block when it fits; >=4 grid steps (both v7x TensorCores + deeper
    # pipeline) for large batches while keeping tiles >=1024 rows.
    tile_rows = max(8, _round_up(tile_rows, 8))
    if B <= tile_rows:
        tr = B
    else:
        tr = min(tile_rows, max(1024, _round_up(pl.cdiv(B, 4), 8)))
    nt = pl.cdiv(B, tr)
    need_mask = (B % tr) != 0   # only the ragged last tile needs masking

    kernel = _make_actor_loss_kernel(B, need_mask)

    partials = pl.pallas_call(
        kernel,
        out_shape=jax.ShapeDtypeStruct((nt, 128), jnp.float32),
        grid_spec=pltpu.PrefetchScalarGridSpec(
            num_scalar_prefetch=0,
            grid=(nt,),
            in_specs=[
                pl.BlockSpec((tr, 1), lambda i: (i, 0)),   # action indices
                pl.BlockSpec((tr, A), lambda i: (i, 0)),   # logits
                pl.BlockSpec((tr, 1), lambda i: (i, 0)),   # V
                pl.BlockSpec((tr, 1), lambda i: (i, 0)),   # ve
            ],
            out_specs=pl.BlockSpec((1, 128), lambda i: (i, 0)),
        ),
        compiler_params=pltpu.CompilerParams(
            dimension_semantics=("parallel",),
            vmem_limit_bytes=32 * 1024 * 1024,
        ),
    )(idx2, l2, v2, ve2)

    # Tiny final reduction + mean divisor in plain JAX.
    return jnp.sum(partials) / jnp.float32(B)


def actor_loss_ref(a, logits, V, ve):
    """Pure-JAX reference for validation."""
    lsm = jax.nn.log_softmax(logits.astype(jnp.float32), axis=-1)
    logp = jnp.sum(a.astype(jnp.float32) * lsm, axis=-1)
    ent = -jnp.sum(jnp.exp(lsm) * lsm, axis=-1)
    v = V.astype(jnp.float32).squeeze(-1)
    adv = v - ve.astype(jnp.float32).squeeze(-1)
    loss = -NS * logp * adv - ND * v - NE * ent
    return jnp.mean(loss)


if __name__ == "__main__":
    key = jax.random.PRNGKey(0)
    ks = jax.random.split(key, 4)

    # Small shapes consistent with the module: batch=2, seq=8, actions=32.
    B, T, A = 2, 8, 32
    logits = jax.random.normal(ks[0], (B, T, A), jnp.float32)     # dist_a logits
    idx = jax.random.categorical(ks[1], logits, axis=-1)
    a = jax.nn.one_hot(idx, A, dtype=jnp.float32)                 # sampled action
    V = jax.random.normal(ks[2], (B, T, 1), jnp.float32)
    ve = jax.random.normal(ks[3], (B, T, 1), jnp.float32)

    loss = actor_loss(a, logits, V, ve)
    jax.block_until_ready(loss)

    ref = actor_loss_ref(a, logits, V, ve)
    assert jnp.allclose(loss, ref, rtol=1e-5, atol=1e-5), (loss, ref)

    # Also exercise a ragged (non-divisible) tiling path with int action input.
    B2, T2 = 3, 7
    logits2 = jax.random.normal(ks[0], (B2, T2, A), jnp.float32)
    idx2 = jax.random.categorical(ks[1], logits2, axis=-1)
    a2 = jax.nn.one_hot(idx2, A, dtype=jnp.float32)
    V2 = jax.random.normal(ks[2], (B2, T2, 1), jnp.float32)
    ve2 = jax.random.normal(ks[3], (B2, T2, 1), jnp.float32)
    loss2 = actor_loss(idx2.astype(jnp.int32), logits2, V2, ve2, tile_rows=8)
    jax.block_until_ready(loss2)
    ref2 = actor_loss_ref(a2, logits2, V2, ve2)
    assert jnp.allclose(loss2, ref2, rtol=1e-5, atol=1e-5), (loss2, ref2)

    print("KERNEL_OK")
</pallas_src>

<mosaic_0001>
module attributes {stable_mosaic.version = 11 : i64} {
  func.func @kernel(%arg0: i32, %arg1: memref<16x1xi32, #tpu.memory_space<vmem>>, %arg2: memref<16x32xf32, #tpu.memory_space<vmem>>, %arg3: memref<16x1xf32, #tpu.memory_space<vmem>>, %arg4: memref<16x1xf32, #tpu.memory_space<vmem>>, %arg5: memref<1x128xf32, #tpu.memory_space<vmem>>) attributes {dimension_semantics = [#tpu.dimension_semantics<parallel>], iteration_bounds = array<i64: 1>, scalar_prefetch = 0 : i64, scratch_operands = 0 : i64, tpu.core_type = #tpu.core_type<tc>, window_params = [{transform_indices = @transform_0, window_bounds = array<i64: 16, 1>}, {transform_indices = @transform_1, window_bounds = array<i64: 16, 32>}, {transform_indices = @transform_2, window_bounds = array<i64: 16, 1>}, {transform_indices = @transform_3, window_bounds = array<i64: 16, 1>}, {transform_indices = @transform_4, window_bounds = array<i64: 1, 128>}]} {
    %c0 = arith.constant 0 : index
    %c0_0 = arith.constant 0 : index
    %0 = vector.load %arg2[%c0, %c0_0] : memref<16x32xf32, #tpu.memory_space<vmem>>, vector<16x32xf32>
    %c0_1 = arith.constant 0 : index
    %c0_2 = arith.constant 0 : index
    %1 = vector.load %arg1[%c0_1, %c0_2] : memref<16x1xi32, #tpu.memory_space<vmem>>, vector<16x1xi32>
    %c0_3 = arith.constant 0 : index
    %c0_4 = arith.constant 0 : index
    %2 = vector.load %arg3[%c0_3, %c0_4] : memref<16x1xf32, #tpu.memory_space<vmem>>, vector<16x1xf32>
    %c0_5 = arith.constant 0 : index
    %c0_6 = arith.constant 0 : index
    %3 = vector.load %arg4[%c0_5, %c0_6] : memref<16x1xf32, #tpu.memory_space<vmem>>, vector<16x1xf32>
    %4 = tpu.iota {dimensions = array<i32: 1>} : vector<16x32xi32>
    %5 = vector.broadcast %1 : vector<16x1xi32> to vector<16x32xi32>
    %6 = arith.cmpi eq, %4, %5 : vector<16x32xi32>
    %cst = arith.constant dense<0xFF800000> : vector<16xf32>
    %7 = vector.multi_reduction <maximumf>, %0, %cst [1] : vector<16x32xf32> to vector<16xf32>
    %8 = vector.shape_cast %7 : vector<16xf32> to vector<16x1xf32>
    %9 = vector.broadcast %8 : vector<16x1xf32> to vector<16x32xf32>
    %10 = arith.subf %0, %9 : vector<16x32xf32>
    %11 = math.exp %10 : vector<16x32xf32>
    %cst_7 = arith.constant dense<0.000000e+00> : vector<16xf32>
    %12 = vector.multi_reduction <add>, %11, %cst_7 [1] : vector<16x32xf32> to vector<16xf32>
    %13 = vector.shape_cast %12 : vector<16xf32> to vector<16x1xf32>
    %14 = math.log %13 : vector<16x1xf32>
    %cst_8 = arith.constant 0.000000e+00 : f32
    %15 = vector.broadcast %cst_8 : f32 to vector<16x32xf32>
    %16 = arith.select %6, %10, %15 : vector<16x32xi1>, vector<16x32xf32>
    %cst_9 = arith.constant dense<0.000000e+00> : vector<16xf32>
    %17 = vector.multi_reduction <add>, %16, %cst_9 [1] : vector<16x32xf32> to vector<16xf32>
    %18 = vector.shape_cast %17 : vector<16xf32> to vector<16x1xf32>
    %19 = arith.subf %18, %14 : vector<16x1xf32>
    %20 = arith.mulf %11, %10 : vector<16x32xf32>
    %cst_10 = arith.constant dense<0.000000e+00> : vector<16xf32>
    %21 = vector.multi_reduction <add>, %20, %cst_10 [1] : vector<16x32xf32> to vector<16xf32>
    %22 = vector.shape_cast %21 : vector<16xf32> to vector<16x1xf32>
    %23 = arith.divf %22, %13 : vector<16x1xf32>
    %24 = arith.subf %14, %23 : vector<16x1xf32>
    %25 = arith.subf %2, %3 : vector<16x1xf32>
    %cst_11 = arith.constant -0.899999976 : f32
    %26 = vector.broadcast %cst_11 : f32 to vector<16x1xf32>
    %27 = arith.mulf %26, %19 : vector<16x1xf32>
    %28 = arith.mulf %27, %25 : vector<16x1xf32>
    %cst_12 = arith.constant 1.000000e-01 : f32
    %29 = vector.broadcast %cst_12 : f32 to vector<16x1xf32>
    %30 = arith.mulf %29, %2 : vector<16x1xf32>
    %31 = arith.subf %28, %30 : vector<16x1xf32>
    %cst_13 = arith.constant 3.000000e-03 : f32
    %32 = vector.broadcast %cst_13 : f32 to vector<16x1xf32>
    %33 = arith.mulf %32, %24 : vector<16x1xf32>
    %34 = arith.subf %31, %33 : vector<16x1xf32>
    %35 = vector.shape_cast %34 : vector<16x1xf32> to vector<1x16x1xf32>
    %cst_14 = arith.constant dense<0.000000e+00> : vector<1xf32>
    %36 = vector.multi_reduction <add>, %35, %cst_14 [1, 2] : vector<1x16x1xf32> to vector<1xf32>
    %37 = vector.shape_cast %36 : vector<1xf32> to vector<1x1x1xf32>
    %38 = vector.extract %37[0, 0, 0] : f32 from vector<1x1x1xf32>
    %39 = tpu.iota {dimensions = array<i32: 1>} : vector<1x128xi32>
    %c0_i32 = arith.constant 0 : i32
    %40 = vector.broadcast %c0_i32 : i32 to vector<1x128xi32>
    %41 = arith.cmpi eq, %39, %40 : vector<1x128xi32>
    %cst_15 = arith.constant 0.000000e+00 : f32
    %42 = vector.broadcast %38 : f32 to vector<1x128xf32>
    %43 = vector.broadcast %cst_15 : f32 to vector<1x128xf32>
    %44 = arith.select %41, %42, %43 : vector<1x128xi1>, vector<1x128xf32>
    %c0_16 = arith.constant 0 : index
    %c0_17 = arith.constant 0 : index
    %45 = vector.load %arg5[%c0_16, %c0_17] : memref<1x128xf32, #tpu.memory_space<vmem>>, vector<1x128xf32>
    tpu.vector_store %arg5[%c0_16, %c0_17], %44 {strides = array<i32>} : memref<1x128xf32, #tpu.memory_space<vmem>>, vector<1x128xf32>,
    return
  }
  func.func @transform_0(%arg0: i32) -> (i32, i32) {
    %c0_i32 = arith.constant 0 : i32
    %c0_i32_0 = arith.constant 0 : i32
    return %arg0, %c0_i32 : i32, i32
  }
  func.func @transform_1(%arg0: i32) -> (i32, i32) {
    %c0_i32 = arith.constant 0 : i32
    %c0_i32_0 = arith.constant 0 : i32
    return %arg0, %c0_i32 : i32, i32
  }
  func.func @transform_2(%arg0: i32) -> (i32, i32) {
    %c0_i32 = arith.constant 0 : i32
    %c0_i32_0 = arith.constant 0 : i32
    return %arg0, %c0_i32 : i32, i32
  }
  func.func @transform_3(%arg0: i32) -> (i32, i32) {
    %c0_i32 = arith.constant 0 : i32
    %c0_i32_0 = arith.constant 0 : i32
    return %arg0, %c0_i32 : i32, i32
  }
  func.func @transform_4(%arg0: i32) -> (i32, i32) {
    %c0_i32 = arith.constant 0 : i32
    %c0_i32_0 = arith.constant 0 : i32
    return %arg0, %c0_i32 : i32, i32
  }
}

</mosaic_0001>

<bundles_post_ra>
// kernel: tpu_custom_call.1
= control target key start
LH: loop header
LB: loop body
LE: loop exit
PB: predicated region body
PF: predicated region fallthrough
CT: control target
= control target key end

     0   :  { %vm36_vm0 = vcmask 261120   ;;  %v170_v4 = vmov 0   ;;  %s246_s0 = inlined_call_operand.vmem [shape: s32[16,1], index: 0, kind: input, shape index: {}]   ;;  %s247_s1 = inlined_call_operand.vmem [shape: f32[16,32], index: 1, kind: input, shape index: {}]   ;;  %s248_s2 = inlined_call_operand.vmem [shape: f32[16,1], index: 2, kind: input, shape index: {}]   ;;  %s249_s3 = inlined_call_operand.vmem [shape: f32[16,1], index: 3, kind: input, shape index: {}]   ;;  %s250_s4 = inlined_call_operand.hbm [shape: f32[1,128], index: 4, kind: output, shape index: {}]  }
   0x1   :  { %v18_v0 = vld [vmem:[%s247_s1] sm:$0xff]  ;;  %v19_v1 = vld [vmem:[%s247_s1 + $0x8] sm:$0xff]  ;;  %132 = vset.pattern.permute.xlu1 %v170_v4  ;;  %133 = vset.pattern.permute.xlu0 %v170_v4 }
   0x2   :  { %v20_v2 = vld [vmem:[%s246_s0] sm:$0xff]  ;;  %v37_v3 = vsel %vm36_vm0, %v18_v0, -inf }
   0x3   :  { %9 = vsyncpa [#allocation3], 0  ;;  %38 = vmax.xlane.f32.xlu0 %v37_v3  ;;  %29 = vperm.xlu1 %132, %v20_v2   ;;  %v40_v5 = vsel %vm36_vm0, %v19_v1, -inf  ;;  %v21_v6 = vld [vmem:[%s246_s0 + $0x8] sm:$0xff]  ;;  %v26_v12 = vlaneseq  ;;  %v22_v34 = vld [vmem:[%s248_s2] sm:$0xff]  ;;  %vm97_vm3 = vcmask 7168  }
   0x4   :  { %v24_v35 = vld [vmem:[%s249_s3] sm:$0xff]  ;;  %v23_v43 = vld [vmem:[%s248_s2 + $0x8] sm:$0xff]  ;;  %v89_v46 = vmul.f32 0.1, %v22_v34  ;;  %s171_s2 = smov [#allocation2]  }
   0x5   :  { %v211_v15 = vand.u32 127, %v26_v12  ;;  %v83_v39 = vsub.f32 %v22_v34, %v24_v35  ;;  %v25_v44 = vld [vmem:[%s249_s3 + $0x8] sm:$0xff]  ;;  %v90_v56 = vmul.f32 0.1, %v23_v43  ;;  %s120_s3 = sshll.u32 %s171_s2, 4  ;;  %s121_s3 = int_to_ptr.vmem [resolvable:$true] %s120_s3 }
   0x6   :  { %v84_v52 = vsub.f32 %v23_v43, %v25_v44  ;;  %s146_s30 = scalar_lea.vmem %s121_s3, 16  ;;  %s150_s5 = scalar_lea.vmem %s121_s3, 32 }
   0x7   :  { %41 = vmax.xlane.f32.xlu0 %v40_v5  ;;  %32 = vperm.xlu1 %132, %v21_v6   ;;  %vm110_vm4 = vcmp.eq.s32.totalorder %v211_v15, 0  ;;  %p147_p0 = scmp.ne.s32.totalorder %s121_s3, %s146_s30  ;;  %p151_p1 = scmp.lt.s32.totalorder %s121_s3, %s121_s3 }
   0x8   :  { %p152_p2 = scmp.lt.s32.totalorder %s150_s5, %s146_s30 }
   0xa   :  { %p153_p3 = por %p152_p2, %p151_p1 }
   0xc   :  { %p154_p4 = pnand %p153_p3, %p147_p0 }
  0x82   :  { %v30_v14 = vpop.permute.xlu1 %29 }
  0x83   :  { %vm34_vm1 = vcmp.eq.s32.totalorder %v211_v15, %v30_v14 }
  0x86   :  { %v33_v17 = vpop.permute.xlu1 %32 }
  0x87   :  { %vm35_vm2 = vcmp.eq.s32.totalorder %v211_v15, %v33_v17 }
  0x90   :  { %v39_v7 = vpop.xlane.xlu0 %38 }
  0x91   :  { %v43_v8 = vsub.f32 %v18_v0, %v39_v7 }
  0x93   :  { %v45_v9 = vmul.f32 1.442695, %v43_v8  ;;  %v59_v19 = vsel %vm34_vm1, %v43_v8, 0.0 }
  0x94   :  { %v42_v10 = vpop.xlane.xlu0 %41  ;;  %v61_v21 = vsel %vm36_vm0, %v59_v19, 0.0 }
  0x95   :  { %134 = vpow2.f32 %v45_v9  ;;  %v44_v11 = vsub.f32 %v19_v1, %v42_v10 }
  0x97   :  { %v47_v13 = vmul.f32 1.442695, %v44_v11  ;;  %v60_v23 = vsel %vm35_vm2, %v44_v11, 0.0 }
  0x98   :  { %v64_v24 = vsel %vm36_vm0, %v60_v23, 0.0 }
  0x99   :  { %136 = vpow2.f32 %v47_v13 }
  0x9f   :  { %v135_v16 = vpop.eup %134 }
  0xa0   :  { %v49_v18 = vsel %vm36_vm0, %v135_v16, 0.0  ;;  %v69_v25 = vmul.f32 %v135_v16, %v43_v8 }
  0xa1   :  { %50 = vadd.xlane.f32.xlu0 %v49_v18 }
  0xa2   :  { %v71_v26 = vsel %vm36_vm0, %v69_v25, 0.0 }
  0xa3   :  { %v137_v20 = vpop.eup %136 }
  0xa4   :  { %v52_v22 = vsel %vm36_vm0, %v137_v20, 0.0  ;;  %v70_v27 = vmul.f32 %v137_v20, %v44_v11 }
  0xa5   :  { %62 = vadd.xlane.f32.xlu0 %v61_v21  ;;  %53 = vadd.xlane.f32.xlu1 %v52_v22 }
  0xa6   :  { %v74_v28 = vsel %vm36_vm0, %v70_v27, 0.0 }
  0xa9   :  { %65 = vadd.xlane.f32.xlu0 %v64_v24 }
  0xad   :  { %72 = vadd.xlane.f32.xlu0 %v71_v26 }
  0xb1   :  { %75 = vadd.xlane.f32.xlu0 %v74_v28 }
 0x12e   :  { %v51_v29 = vpop.xlane.xlu0 %50 }
 0x12f   :  { %138 = vlog2.f32 %v51_v29 }
 0x130   :  { %140 = vrcp.f32 %v51_v29 }
 0x132   :  { %v54_v30 = vpop.xlane.xlu1 %53  ;;  %v63_v31 = vpop.xlane.xlu0 %62 }
 0x133   :  { %142 = vlog2.f32 %v54_v30 }
 0x134   :  { %144 = vrcp.f32 %v54_v30 }
 0x136   :  { %v66_v32 = vpop.xlane.xlu0 %65 }
 0x139   :  { %v139_v33 = vpop.eup %138 }
 0x13a   :  { %v141_v36 = vpop.eup %140  ;;  %v56_v37 = vmul.f32 0.6931472, %v139_v33  ;;  %v73_v38 = vpop.xlane.xlu0 %72 }
 0x13b   :  { %v78_v41 = vmul.f32 %v141_v36, %v73_v38 }
 0x13c   :  { %v67_v40 = vsub.f32 %v63_v31, %v56_v37 }
 0x13d   :  { %v143_v42 = vpop.eup %142  ;;  %v81_v54 = vsub.f32 %v56_v37, %v78_v41 }
 0x13e   :  { %v145_v45 = vpop.eup %144  ;;  %v85_v47 = vmul.f32 -0.9, %v67_v40  ;;  %v58_v48 = vmul.f32 0.6931472, %v143_v42  ;;  %v76_v49 = vpop.xlane.xlu0 %75 }
 0x13f   :  { %v80_v50 = vmul.f32 %v145_v45, %v76_v49  ;;  %v93_v60 = vmul.f32 0.003, %v81_v54 }
 0x140   :  { %v87_v51 = vmul.f32 %v85_v47, %v83_v39  ;;  %v68_v53 = vsub.f32 %v66_v32, %v58_v48 }
 0x141   :  { %v82_v58 = vsub.f32 %v58_v48, %v80_v50 }
 0x142   :  { %v91_v55 = vsub.f32 %v87_v51, %v89_v46  ;;  %v86_v57 = vmul.f32 -0.9, %v68_v53 }
 0x143   :  { %v94_v62 = vmul.f32 0.003, %v82_v58 }
 0x144   :  { %v88_v59 = vmul.f32 %v86_v57, %v84_v52  ;;  %v95_v63 = vsub.f32 %v91_v55, %v93_v60 }
 0x146   :  { %v92_v61 = vsub.f32 %v88_v59, %v90_v56  ;;  %v98_v1 = vsel %vm97_vm3, %v95_v63, 0.0 }
 0x148   :  { %v96_v0 = vsub.f32 %v92_v61, %v94_v62 }
 0x14a   :  { %v99_v2 = vsel %vm97_vm3, %v96_v0, 0.0 }
 0x14b   :  { %v100_v3 = vadd.f32 %v99_v2, %v98_v1 }
 0x14d   :  { %101 = vadd.xlane.f32.xlu0 %v100_v3 }
 0x1da   :  { %v102_v4 = vpop.xlane.xlu0 %101 }
 0x1db   :  { %v103_v5 = vrot.slane %v102_v4, 4 }
 0x1dd   :  { %v104_v6 = vadd.f32 %v103_v5, %v102_v4 }
 0x1df   :  { %v105_v7 = vrot.slane %v104_v6, 2 }
 0x1e1   :  { %v106_v8 = vadd.f32 %v105_v7, %v104_v6 }
 0x1e3   :  { %v107_v9 = vrot.slane %v106_v8, 1 }
 0x1e5   :  { %v108_v10 = vadd.f32 %v107_v9, %v106_v8 }
 0x1e7   :  { %128 = vpush %v108_v10 }
 0x218   :  { %s129_s29 = spop %128 }
 0x219   :  { %v111_v11 = vstv %s129_s29 }
 0x21a   :  { %v112_v12 = vsel %vm110_vm4, %v111_v11, 0.0 }
 0x21b   :  { %113 = vst [vmem:[#allocation2] sm:$0x1] %v112_v12 }
 0x21c   :  { %157 = shalt.err (!%p154_p4)
}
 0x21d   :  { %s158_s8 = scalar_lea.hbm %s250_s4, 16 }
 0x21e   :  { %p159_p5 = scmp.ne.s32.totalorder %s250_s4, %s158_s8  ;;  %p162_p6 = scmp.lt.u32.totalorder %s158_s8, %s250_s4 }
 0x220   :  { %p164_p7 = pnand %p162_p6, %p159_p5 }
 0x222   :  { %167 = shalt.err (!%p164_p7)
}
 0x223   :  { %123 = dma.vmem_to_hbm [thread:$0]  %s121_s3, 16, %s250_s4, [#allocation3]  }
 0x224   :  { %168 = dma.done.wait [#allocation3], 16  }
 0x225   :  { %169 = vsyncadd [#allocation3], 4294967280 }
 0x226   :  { %127 = vsyncpa [#allocation3], 1 }

</bundles_post_ra>
